<compile_context>
chip_gen: v5e
topology: v5e:2x2
jax: 0.10.0
libtpu: 0.0.40
codegen_flags: <defaults>
</compile_context>

<pallas_src>
import numpy as np
import jax
import jax.numpy as jnp
from jax.experimental import pallas as pl
from jax.experimental.pallas import tpu as pltpu

# ---- registered-buffer scalars / hyperparameters (baked as constants) --------
FOCAL = 500.0          # synthetic pinhole camera focal length
CX = 0.0               # principal point x
CY = 0.0               # principal point y
CAM_TZ = 2.5           # camera translation along z (keeps z > 0)
DATA_WEIGHT = 1.0
BODY_POSE_WEIGHT = 1.0
SHAPE_WEIGHT = 0.5
WEIGHT_W = 1e-3
HEIGHT_W = 1e-3

FOREHEAD_VERT_ID = 336


def smplify_loss(gt_joints, vertices, model_joints_raw, joints_conf,
                 joint_weights, pose_embedding, betas, gender_tensor,
                 w1, b1, w2, b2, weight_gt, height_gt):
    f32 = jnp.float32
    B, J, _ = gt_joints.shape
    NB = betas.shape[1]
    P = pose_embedding.shape[1]
    H = w1.shape[1]
    KIN = 2 + NB                      # betanet input width: concat(gender, betas)

    # ---- column layout of the packed per-batch "small" buffer ----------------
    c_pe = KIN                        # pose embedding start
    c_wgt = c_pe + P                  # target weight
    c_hgt = c_wgt + 1                 # target height
    c_b2w = c_hgt + 1                 # betanet output bias (weight)
    c_b2h = c_b2w + 1                 # betanet output bias (height)
    c_fh = c_b2h + 1                  # forehead vertex x, y, z

    # ---- operand packing (replaces scatter + 2 transposes + concat prologue) -
    joints_packed = jnp.concatenate([
        jnp.transpose(gt_joints.astype(f32), (2, 0, 1)),          # (2,B,J)
        jnp.transpose(model_joints_raw.astype(f32), (2, 0, 1)),   # (3,B,J)
        joints_conf.astype(f32)[None],                            # (1,B,J)
        joint_weights.astype(f32)[None],                          # (1,B,J)
    ], axis=0)                                                    # (7,B,J)

    small_packed = jnp.concatenate([
        gender_tensor.astype(f32),                                # (B,2)
        betas.astype(f32),                                        # (B,NB)
        pose_embedding.astype(f32),                               # (B,P)
        weight_gt.reshape(B, 1).astype(f32),                      # (B,1)
        height_gt.reshape(B, 1).astype(f32),                      # (B,1)
        jnp.broadcast_to(b2.reshape(1, 2).astype(f32), (B, 2)),   # (B,2)
        vertices[:, FOREHEAD_VERT_ID, :].astype(f32),             # (B,3)
    ], axis=1)                                                    # (B,K)

    mlp_params = jnp.concatenate([
        w1.astype(f32),                                           # (KIN,H)
        b1.reshape(1, H).astype(f32),                             # (1,H)
        jnp.transpose(w2.astype(f32)),                            # (2,H)
    ], axis=0)                                                    # (KIN+3,H)

    def kernel(jp_ref, sv_ref, pp_ref, out_ref):
        sv = sv_ref[...]                                          # (B,K)
        pp = pp_ref[...]                                          # (KIN+3,H)

        # ---- camera(model_joints) with forehead vertex spliced into joint 0 --
        gx, gy = jp_ref[0], jp_ref[1]                             # (B,J)
        x, y, z = jp_ref[2], jp_ref[3], jp_ref[4]
        conf, jw = jp_ref[5], jp_ref[6]

        is_j0 = jax.lax.broadcasted_iota(jnp.int32, (B, J), 1) == 0
        x = jnp.where(is_j0, sv[:, c_fh + 0:c_fh + 1], x)
        y = jnp.where(is_j0, sv[:, c_fh + 1:c_fh + 2], y)
        z = jnp.where(is_j0, sv[:, c_fh + 2:c_fh + 3], z)

        inv_z = pl.reciprocal(z + CAM_TZ, approx=True)            # EUP slot
        ex = gx - (FOCAL * x * inv_z + CX)
        ey = gy - (FOCAL * y * inv_z + CY)
        w = jw * conf
        joint_loss = jnp.sum(w * w * (ex * ex + ey * ey),
                             axis=1, keepdims=True) * (DATA_WEIGHT ** 2)   # (B,1)

        # ---- vposer pose prior (batch-global scalar, added to every row) -----
        pe = sv[:, c_pe:c_pe + P]
        pprior_loss = jnp.sum(pe * pe) * (BODY_POSE_WEIGHT ** 2)

        # ---- shape prior ------------------------------------------------------
        bet = sv[:, 2:2 + NB]
        shape_loss = jnp.sum(bet * bet, axis=1, keepdims=True) * (SHAPE_WEIGHT ** 2)

        # ---- betanet MLP: layer 1 on MXU, layer 2 as two VPU reductions -------
        feat = sv[:, 0:KIN]                                        # (B,KIN)
        h = jnp.dot(feat, pp[0:KIN, :],
                    preferred_element_type=jnp.float32) + pp[KIN:KIN + 1, :]
        h = jnp.maximum(h, 0.0)                                    # (B,H)
        w_est = jnp.sum(h * pp[KIN + 1:KIN + 2, :], axis=1, keepdims=True) \
            + sv[:, c_b2w:c_b2w + 1]                               # (B,1)
        h_est = 100.0 * (jnp.sum(h * pp[KIN + 2:KIN + 3, :], axis=1, keepdims=True)
                         + sv[:, c_b2h:c_b2h + 1])                 # (B,1)
        d_w = sv[:, c_wgt:c_wgt + 1] - w_est
        d_h = sv[:, c_hgt:c_hgt + 1] - h_est
        physical_loss = d_w * d_w * WEIGHT_W + d_h * d_h * HEIGHT_W

        total = joint_loss + shape_loss + physical_loss + pprior_loss   # (B,1)
        out_ref[...] = jnp.sum(total, axis=0, keepdims=True)            # (1,1)

    vmem = pltpu.MemorySpace.VMEM
    out = pl.pallas_call(
        kernel,
        out_shape=jax.ShapeDtypeStruct((1, 1), jnp.float32),
        in_specs=[pl.BlockSpec(memory_space=vmem)] * 3,
        out_specs=pl.BlockSpec(memory_space=vmem),
    )(joints_packed, small_packed, mlp_params)
    return jnp.reshape(out, ())      # metadata-only reshape, no extra launch


def reference_loss(gt_joints, vertices, model_joints_raw, joints_conf,
                   joint_weights, pose_embedding, betas, gender_tensor,
                   w1, b1, w2, b2, weight_gt, height_gt):
    model_joints = model_joints_raw.at[:, 0, :].set(vertices[:, FOREHEAD_VERT_ID, :])
    x = model_joints[..., 0]
    y = model_joints[..., 1]
    z = model_joints[..., 2] + CAM_TZ
    proj = jnp.stack([FOCAL * x / z + CX, FOCAL * y / z + CY], axis=-1)
    w = (joint_weights * joints_conf)[..., None]
    joint_loss = jnp.sum(w ** 2 * (gt_joints - proj) ** 2, axis=(1, 2)) * DATA_WEIGHT ** 2
    pprior = jnp.sum(pose_embedding ** 2) * BODY_POSE_WEIGHT ** 2
    shape_loss = jnp.sum(betas ** 2, axis=1) * SHAPE_WEIGHT ** 2
    feat = jnp.concatenate([gender_tensor, betas], axis=1)
    h = jnp.maximum(feat @ w1 + b1, 0.0)
    est = h @ w2 + b2
    d_w = weight_gt - est[:, 0]
    d_h = height_gt - 100.0 * est[:, 1]
    physical = d_w ** 2 * WEIGHT_W + d_h ** 2 * HEIGHT_W
    return jnp.sum(joint_loss + pprior + shape_loss + physical)


if __name__ == "__main__":
    B, J, V = 2, 25, 400          # batch, joints, vertices (forehead id 336 < V)
    POSE_DIM, NUM_BETAS, HIDDEN = 32, 10, 32

    key = jax.random.PRNGKey(0)
    ks = jax.random.split(key, 10)

    gt_joints = jax.random.normal(ks[0], (B, J, 2), jnp.float32) * 50.0
    model_joints_raw = jax.random.normal(ks[1], (B, J, 3), jnp.float32) * 0.2
    vertices = jax.random.normal(ks[2], (B, V, 3), jnp.float32) * 0.2
    joints_conf = jax.nn.sigmoid(jax.random.normal(ks[3], (B, J), jnp.float32))
    joint_weights = jnp.ones((B, J), jnp.float32)
    pose_embedding = jax.random.normal(ks[4], (B, POSE_DIM), jnp.float32) * 0.1
    betas = jax.random.normal(ks[5], (B, NUM_BETAS), jnp.float32) * 0.5

    # gender buffer: 'male' -> [0, 1], otherwise [1, 0]  (genders = ['male','female'])
    gender_tensor = jnp.array([[0.0, 1.0], [1.0, 0.0]], jnp.float32)
    weight_gt = jnp.array([70.0, 65.0], jnp.float32)    # registered buffer `weight`
    height_gt = jnp.array([175.0, 160.0], jnp.float32)  # registered buffer `height`

    # deterministic synthetic betanet parameters
    w1 = jax.random.normal(ks[6], (2 + NUM_BETAS, HIDDEN), jnp.float32) * 0.1
    b1 = jax.random.normal(ks[7], (HIDDEN,), jnp.float32) * 0.01
    w2 = jax.random.normal(ks[8], (HIDDEN, 2), jnp.float32) * 0.1
    b2 = jnp.array([0.7, 1.7], jnp.float32)   # rough weight/height bias

    args = (gt_joints, vertices, model_joints_raw, joints_conf, joint_weights,
            pose_embedding, betas, gender_tensor, w1, b1, w2, b2,
            weight_gt, height_gt)

    out = jax.jit(smplify_loss)(*args)
    out = jax.block_until_ready(out)

    ref = reference_loss(*args)
    np.testing.assert_allclose(np.asarray(out), np.asarray(ref), rtol=2e-3, atol=1e-3)

    print("KERNEL_OK")
</pallas_src>

<mosaic_0001>
module attributes {stable_mosaic.version = 11 : i64} {
  func.func @kernel(%arg0: memref<7x2x25xf32, #tpu.memory_space<vmem>>, %arg1: memref<2x51xf32, #tpu.memory_space<vmem>>, %arg2: memref<15x32xf32, #tpu.memory_space<vmem>>, %arg3: memref<1x1xf32, #tpu.memory_space<vmem>>) attributes {dimension_semantics = [], scalar_prefetch = 0 : i64, scratch_operands = 0 : i64, tpu.core_type = #tpu.core_type<tc>} {
    %c0 = arith.constant 0 : index
    %c0_0 = arith.constant 0 : index
    %0 = vector.load %arg1[%c0, %c0_0] : memref<2x51xf32, #tpu.memory_space<vmem>>, vector<2x51xf32>
    %c0_1 = arith.constant 0 : index
    %c0_2 = arith.constant 0 : index
    %1 = vector.load %arg2[%c0_1, %c0_2] : memref<15x32xf32, #tpu.memory_space<vmem>>, vector<15x32xf32>
    %c0_3 = arith.constant 0 : index
    %c0_4 = arith.constant 0 : index
    %c0_5 = arith.constant 0 : index
    %2 = vector.load %arg0[%c0_3, %c0_4, %c0_5] : memref<7x2x25xf32, #tpu.memory_space<vmem>>, vector<1x2x25xf32>
    %3 = vector.shape_cast %2 : vector<1x2x25xf32> to vector<2x25xf32>
    %c1 = arith.constant 1 : index
    %c0_6 = arith.constant 0 : index
    %c0_7 = arith.constant 0 : index
    %4 = vector.load %arg0[%c1, %c0_6, %c0_7] : memref<7x2x25xf32, #tpu.memory_space<vmem>>, vector<1x2x25xf32>
    %5 = vector.shape_cast %4 : vector<1x2x25xf32> to vector<2x25xf32>
    %c2 = arith.constant 2 : index
    %c0_8 = arith.constant 0 : index
    %c0_9 = arith.constant 0 : index
    %6 = vector.load %arg0[%c2, %c0_8, %c0_9] : memref<7x2x25xf32, #tpu.memory_space<vmem>>, vector<1x2x25xf32>
    %7 = vector.shape_cast %6 : vector<1x2x25xf32> to vector<2x25xf32>
    %c3 = arith.constant 3 : index
    %c0_10 = arith.constant 0 : index
    %c0_11 = arith.constant 0 : index
    %8 = vector.load %arg0[%c3, %c0_10, %c0_11] : memref<7x2x25xf32, #tpu.memory_space<vmem>>, vector<1x2x25xf32>
    %9 = vector.shape_cast %8 : vector<1x2x25xf32> to vector<2x25xf32>
    %c4 = arith.constant 4 : index
    %c0_12 = arith.constant 0 : index
    %c0_13 = arith.constant 0 : index
    %10 = vector.load %arg0[%c4, %c0_12, %c0_13] : memref<7x2x25xf32, #tpu.memory_space<vmem>>, vector<1x2x25xf32>
    %11 = vector.shape_cast %10 : vector<1x2x25xf32> to vector<2x25xf32>
    %c5 = arith.constant 5 : index
    %c0_14 = arith.constant 0 : index
    %c0_15 = arith.constant 0 : index
    %12 = vector.load %arg0[%c5, %c0_14, %c0_15] : memref<7x2x25xf32, #tpu.memory_space<vmem>>, vector<1x2x25xf32>
    %13 = vector.shape_cast %12 : vector<1x2x25xf32> to vector<2x25xf32>
    %c6 = arith.constant 6 : index
    %c0_16 = arith.constant 0 : index
    %c0_17 = arith.constant 0 : index
    %14 = vector.load %arg0[%c6, %c0_16, %c0_17] : memref<7x2x25xf32, #tpu.memory_space<vmem>>, vector<1x2x25xf32>
    %15 = vector.shape_cast %14 : vector<1x2x25xf32> to vector<2x25xf32>
    %16 = tpu.iota {dimensions = array<i32: 1>} : vector<2x25xi32>
    %c0_i32 = arith.constant 0 : i32
    %17 = vector.broadcast %c0_i32 : i32 to vector<2x25xi32>
    %18 = arith.cmpi eq, %16, %17 : vector<2x25xi32>
    %19 = vector.extract_strided_slice %0 {offsets = [0, 48], sizes = [2, 1], strides = [1, 1]} : vector<2x51xf32> to vector<2x1xf32>
    %20 = vector.shape_cast %19 : vector<2x1xf32> to vector<2x1xf32>
    %21 = vector.broadcast %20 : vector<2x1xf32> to vector<2x25xf32>
    %22 = arith.select %18, %21, %7 : vector<2x25xi1>, vector<2x25xf32>
    %23 = vector.extract_strided_slice %0 {offsets = [0, 49], sizes = [2, 1], strides = [1, 1]} : vector<2x51xf32> to vector<2x1xf32>
    %24 = vector.shape_cast %23 : vector<2x1xf32> to vector<2x1xf32>
    %25 = vector.broadcast %24 : vector<2x1xf32> to vector<2x25xf32>
    %26 = arith.select %18, %25, %9 : vector<2x25xi1>, vector<2x25xf32>
    %27 = vector.extract_strided_slice %0 {offsets = [0, 50], sizes = [2, 1], strides = [1, 1]} : vector<2x51xf32> to vector<2x1xf32>
    %28 = vector.shape_cast %27 : vector<2x1xf32> to vector<2x1xf32>
    %29 = vector.broadcast %28 : vector<2x1xf32> to vector<2x25xf32>
    %30 = arith.select %18, %29, %11 : vector<2x25xi1>, vector<2x25xf32>
    %cst = arith.constant 2.500000e+00 : f32
    %31 = vector.broadcast %cst : f32 to vector<2x25xf32>
    %32 = arith.addf %30, %31 : vector<2x25xf32>
    %33 = tpu.reciprocal %32 {approx = true} : vector<2x25xf32> -> vector<2x25xf32>
    %cst_18 = arith.constant 5.000000e+02 : f32
    %34 = vector.broadcast %cst_18 : f32 to vector<2x25xf32>
    %35 = arith.mulf %34, %22 : vector<2x25xf32>
    %36 = arith.mulf %35, %33 : vector<2x25xf32>
    %cst_19 = arith.constant 0.000000e+00 : f32
    %37 = vector.broadcast %cst_19 : f32 to vector<2x25xf32>
    %38 = arith.addf %36, %37 : vector<2x25xf32>
    %39 = arith.subf %3, %38 : vector<2x25xf32>
    %cst_20 = arith.constant 5.000000e+02 : f32
    %40 = vector.broadcast %cst_20 : f32 to vector<2x25xf32>
    %41 = arith.mulf %40, %26 : vector<2x25xf32>
    %42 = arith.mulf %41, %33 : vector<2x25xf32>
    %cst_21 = arith.constant 0.000000e+00 : f32
    %43 = vector.broadcast %cst_21 : f32 to vector<2x25xf32>
    %44 = arith.addf %42, %43 : vector<2x25xf32>
    %45 = arith.subf %5, %44 : vector<2x25xf32>
    %46 = arith.mulf %15, %13 : vector<2x25xf32>
    %47 = arith.mulf %46, %46 : vector<2x25xf32>
    %48 = arith.mulf %39, %39 : vector<2x25xf32>
    %49 = arith.mulf %45, %45 : vector<2x25xf32>
    %50 = arith.addf %48, %49 : vector<2x25xf32>
    %51 = arith.mulf %47, %50 : vector<2x25xf32>
    %cst_22 = arith.constant dense<0.000000e+00> : vector<2xf32>
    %52 = vector.multi_reduction <add>, %51, %cst_22 [1] : vector<2x25xf32> to vector<2xf32>
    %53 = vector.shape_cast %52 : vector<2xf32> to vector<2x1xf32>
    %cst_23 = arith.constant 1.000000e+00 : f32
    %54 = vector.broadcast %cst_23 : f32 to vector<2x1xf32>
    %55 = arith.mulf %53, %54 : vector<2x1xf32>
    %56 = vector.extract_strided_slice %0 {offsets = [0, 12], sizes = [2, 32], strides = [1, 1]} : vector<2x51xf32> to vector<2x32xf32>
    %57 = arith.mulf %56, %56 : vector<2x32xf32>
    %58 = vector.shape_cast %57 : vector<2x32xf32> to vector<1x2x32xf32>
    %cst_24 = arith.constant dense<0.000000e+00> : vector<1xf32>
    %59 = vector.multi_reduction <add>, %58, %cst_24 [1, 2] : vector<1x2x32xf32> to vector<1xf32>
    %60 = vector.shape_cast %59 : vector<1xf32> to vector<1x1x1xf32>
    %61 = vector.extract %60[0, 0, 0] : f32 from vector<1x1x1xf32>
    %cst_25 = arith.constant 1.000000e+00 : f32
    %62 = arith.mulf %61, %cst_25 : f32
    %63 = vector.extract_strided_slice %0 {offsets = [0, 2], sizes = [2, 10], strides = [1, 1]} : vector<2x51xf32> to vector<2x10xf32>
    %64 = arith.mulf %63, %63 : vector<2x10xf32>
    %cst_26 = arith.constant dense<0.000000e+00> : vector<2xf32>
    %65 = vector.multi_reduction <add>, %64, %cst_26 [1] : vector<2x10xf32> to vector<2xf32>
    %66 = vector.shape_cast %65 : vector<2xf32> to vector<2x1xf32>
    %cst_27 = arith.constant 2.500000e-01 : f32
    %67 = vector.broadcast %cst_27 : f32 to vector<2x1xf32>
    %68 = arith.mulf %66, %67 : vector<2x1xf32>
    %69 = vector.extract_strided_slice %0 {offsets = [0, 0], sizes = [2, 12], strides = [1, 1]} : vector<2x51xf32> to vector<2x12xf32>
    %70 = vector.extract_strided_slice %1 {offsets = [0, 0], sizes = [12, 32], strides = [1, 1]} : vector<15x32xf32> to vector<12x32xf32>
    %cst_28 = arith.constant dense<0.000000e+00> : vector<2x32xf32>
    %71 = tpu.matmul %69, %70, %cst_28 {dimension_numbers = #tpu.dot_dimension_numbers<[1], [0], [0], [1], [0, 0, 1, 1], [], []>} : vector<2x12xf32>, vector<12x32xf32>, vector<2x32xf32> -> vector<2x32xf32>
    %72 = vector.extract_strided_slice %1 {offsets = [12, 0], sizes = [1, 32], strides = [1, 1]} : vector<15x32xf32> to vector<1x32xf32>
    %73 = vector.broadcast %72 : vector<1x32xf32> to vector<2x32xf32>
    %74 = arith.addf %71, %73 : vector<2x32xf32>
    %cst_29 = arith.constant 0.000000e+00 : f32
    %75 = vector.broadcast %cst_29 : f32 to vector<2x32xf32>
    %76 = arith.maximumf %74, %75 : vector<2x32xf32>
    %77 = vector.extract_strided_slice %1 {offsets = [13, 0], sizes = [1, 32], strides = [1, 1]} : vector<15x32xf32> to vector<1x32xf32>
    %78 = vector.broadcast %77 : vector<1x32xf32> to vector<2x32xf32>
    %79 = arith.mulf %76, %78 : vector<2x32xf32>
    %cst_30 = arith.constant dense<0.000000e+00> : vector<2xf32>
    %80 = vector.multi_reduction <add>, %79, %cst_30 [1] : vector<2x32xf32> to vector<2xf32>
    %81 = vector.shape_cast %80 : vector<2xf32> to vector<2x1xf32>
    %82 = vector.extract_strided_slice %0 {offsets = [0, 46], sizes = [2, 1], strides = [1, 1]} : vector<2x51xf32> to vector<2x1xf32>
    %83 = arith.addf %81, %82 : vector<2x1xf32>
    %84 = vector.extract_strided_slice %1 {offsets = [14, 0], sizes = [1, 32], strides = [1, 1]} : vector<15x32xf32> to vector<1x32xf32>
    %85 = vector.broadcast %84 : vector<1x32xf32> to vector<2x32xf32>
    %86 = arith.mulf %76, %85 : vector<2x32xf32>
    %cst_31 = arith.constant dense<0.000000e+00> : vector<2xf32>
    %87 = vector.multi_reduction <add>, %86, %cst_31 [1] : vector<2x32xf32> to vector<2xf32>
    %88 = vector.shape_cast %87 : vector<2xf32> to vector<2x1xf32>
    %89 = vector.extract_strided_slice %0 {offsets = [0, 47], sizes = [2, 1], strides = [1, 1]} : vector<2x51xf32> to vector<2x1xf32>
    %90 = arith.addf %88, %89 : vector<2x1xf32>
    %cst_32 = arith.constant 1.000000e+02 : f32
    %91 = vector.broadcast %cst_32 : f32 to vector<2x1xf32>
    %92 = arith.mulf %91, %90 : vector<2x1xf32>
    %93 = vector.extract_strided_slice %0 {offsets = [0, 44], sizes = [2, 1], strides = [1, 1]} : vector<2x51xf32> to vector<2x1xf32>
    %94 = arith.subf %93, %83 : vector<2x1xf32>
    %95 = vector.extract_strided_slice %0 {offsets = [0, 45], sizes = [2, 1], strides = [1, 1]} : vector<2x51xf32> to vector<2x1xf32>
    %96 = arith.subf %95, %92 : vector<2x1xf32>
    %97 = arith.mulf %94, %94 : vector<2x1xf32>
    %cst_33 = arith.constant 1.000000e-03 : f32
    %98 = vector.broadcast %cst_33 : f32 to vector<2x1xf32>
    %99 = arith.mulf %97, %98 : vector<2x1xf32>
    %100 = arith.mulf %96, %96 : vector<2x1xf32>
    %cst_34 = arith.constant 1.000000e-03 : f32
    %101 = vector.broadcast %cst_34 : f32 to vector<2x1xf32>
    %102 = arith.mulf %100, %101 : vector<2x1xf32>
    %103 = arith.addf %99, %102 : vector<2x1xf32>
    %104 = arith.addf %55, %68 : vector<2x1xf32>
    %105 = arith.addf %104, %103 : vector<2x1xf32>
    %106 = vector.broadcast %62 : f32 to vector<2x1xf32>
    %107 = arith.addf %105, %106 : vector<2x1xf32>
    %cst_35 = arith.constant dense<0.000000e+00> : vector<1xf32>
    %108 = vector.multi_reduction <add>, %107, %cst_35 [0] : vector<2x1xf32> to vector<1xf32>
    %109 = vector.shape_cast %108 : vector<1xf32> to vector<1x1xf32>
    %c0_36 = arith.constant 0 : index
    %c0_37 = arith.constant 0 : index
    %110 = vector.load %arg3[%c0_36, %c0_37] : memref<1x1xf32, #tpu.memory_space<vmem>>, vector<1x1xf32>
    tpu.vector_store %arg3[%c0_36, %c0_37], %109 {strides = array<i32>} : memref<1x1xf32, #tpu.memory_space<vmem>>, vector<1x1xf32>,
    return
  }
}

</mosaic_0001>

<bundles_post_ra>
// kernel: smplify_loss.1
= control target key start
LH: loop header
LB: loop body
LE: loop exit
PB: predicated region body
PF: predicated region fallthrough
CT: control target
= control target key end

     0   :  { %vm98_vm0 = vcmask 1043456   ;;  %vm95_vm1 = vcmask 97280   ;;  %s312_s0 = inlined_call_operand.vmem [shape: f32[7,2,25], index: 0, kind: input, shape index: {}]   ;;  %s313_s1 = inlined_call_operand.vmem [shape: f32[2,51], index: 1, kind: input, shape index: {}]   ;;  %s314_s2 = inlined_call_operand.vmem [shape: f32[15,32], index: 2, kind: input, shape index: {}]   ;;  %s315_s3 = inlined_call_operand.hbm [shape: f32[1,1], index: 3, kind: output, shape index: {}]  }
   0x1   :  { %v17_v0 = vld [vmem:[%s314_s2 + $0x8] sm:$0x7f]  ;;  %v16_v1 = vld [vmem:[%s314_s2] sm:$0xff] }
   0x2   :  { %v276_v2 = vld [vmem:[%s313_s1] sm:$0x3]  ;;  %195 = vmatpush.msk.msra.mxu0 %vm98_vm0, %v17_v0 }
   0x3   :  { %v70_v3 = vmul.f32 %v276_v2, %v276_v2 }
   0x4   :  { %8 = vsyncpa [#allocation3], 0  ;;  %v239_v4 = vmov 48   ;;  %117 = vmatpush.msra.mxu0 %v16_v1  ;;  %s240_s18 = smov 116   ;;  %v241_v5 = vmov 50   ;;  %v242_v6 = vmov 49   ;;  %v31_v20 = vlaneseq }
   0x5   :  { %208 = vset.pattern.permute.xlu2 %v239_v4  ;;  %72 = vrot.lane.b32.xlu0 %v70_v3, %s240_s18  ;;  %vm75_vm2 = vcmask 254976   ;;  %v94_v9 = vperm.slane %v17_v0, 4  ;;  %v123_v12 = vperm.slane %v17_v0, 5  ;;  %v129_v13 = vperm.slane %v17_v0, 6  ;;  %s243_s1 = smov 126   ;;  %s245_s6 = smov 84  }
   0x6   :  { %196 = vmatmul.msk.f32.vlgmr.msra.gmra.mxu0 %vm95_vm1, %v276_v2  ;;  %36 = vperm.xlu2 %208, %v276_v2   ;;  %v32_v21 = vand.u32 127, %v31_v20  ;;  %v192_v23 = vld [vmem:[%s312_s0 + $0x8] sm:$0x3]  ;;  %v190_v27 = vld [vmem:[%s312_s0 + $0x4] sm:$0x3]  ;;  %vm66_vm4 = vcmask 197632  }
   0x7   :  { %207 = vset.pattern.permute.xlu1 %v241_v5  ;;  %210 = vset.pattern.permute.xlu0 %v241_v5  ;;  %v191_v28 = vld [vmem:[%s312_s0 + $0x6] sm:$0x3]  ;;  %v18_v44 = vld [vmem:[%s312_s0] sm:$0x3]  ;;  %v189_v45 = vld [vmem:[%s312_s0 + $0x2] sm:$0x3] }
   0x8   :  { %46 = vperm.xlu1 %207, %v276_v2   ;;  %vm33_vm3 = vcmp.eq.s32.totalorder %v32_v21, 0  ;;  %v193_v49 = vld [vmem:[%s312_s0 + $0xa] sm:$0x3]  ;;  %v194_v50 = vld [vmem:[%s312_s0 + $0xc] sm:$0x3]  ;;  %vm89_vm5 = vcmask 74752  }
   0x9   :  { %v60_v51 = vmul.f32 %v194_v50, %v193_v49  ;;  %s244_s0 = smov 127   ;;  %vm159_vm6 = vcmask 361824   ;;  %s246_s7 = smov [#allocation2]   ;;  %vm171_vm7 = vcmask 0  }
   0xa   :  { %s178_s8 = sshll.u32 %s246_s7, 4  ;;  %s180_s11 = sshll.u32 %s315_s3, 4  ;;  %s179_s8 = int_to_ptr.vmem [resolvable:$true] %s178_s8  ;;  %s181_s11 = int_to_ptr.hbm [resolvable:$true] %s180_s11 }
   0xb   :  { %v61_v54 = vmul.f32 %v60_v51, %v60_v51 }
   0xe   :  { %209 = vset.pattern.permute.xlu2 %v242_v6 }
   0xf   :  { %41 = vperm.xlu2 %209, %v276_v2  }
  0x60   :  { %v37_v19 = vpop.permute.xlu2 %36 }
  0x61   :  { %v39_v33 = vsel %vm33_vm3, %v37_v19, %v190_v27 }
  0x62   :  { %v52_v38 = vmul.f32 500.0, %v39_v33 }
  0x69   :  { %v42_v22 = vpop.permute.xlu2 %41 }
  0x6a   :  { %v44_v34 = vsel %vm33_vm3, %v42_v22, %v191_v28 }
  0x6b   :  { %v56_v39 = vmul.f32 500.0, %v44_v34 }
  0x77   :  { %v73_v7 = vpop.permute.xlu0 %72 }
  0x78   :  { %v76_v8 = vsel %vm75_vm2, %v73_v7, 0.0 }
  0x79   :  { %77 = vadd.xlane.f32.xlu1 %v76_v8 }
  0x7a   :  { %v47_v24 = vpop.permute.xlu1 %46 }
  0x7b   :  { %v49_v25 = vsel %vm33_vm3, %v47_v24, %v192_v23 }
  0x7c   :  { %v50_v26 = vadd.f32 2.5, %v49_v25 }
  0x7e   :  { %211 = vrcp.f32 %v50_v26 }
  0x83   :  { %v119_v10 = vpop.f32.mrf.mxu0 }
  0x84   :  { %v120_v11 = vadd.f32 %v119_v10, %v94_v9  ;;  %v212_v40 = vpop.eup %211 }
  0x85   :  { %v53_v42 = vmul.f32 %v212_v40, %v52_v38  ;;  %v57_v43 = vmul.f32 %v212_v40, %v56_v39 }
  0x86   :  { %v122_v14 = vmax.f32 %v120_v11, 0.0 }
  0x87   :  { %v55_v47 = vsub.f32 %v18_v44, %v53_v42  ;;  %v59_v48 = vsub.f32 %v189_v45, %v57_v43 }
  0x88   :  { %v124_v15 = vmul.f32 %v123_v12, %v122_v14  ;;  %v130_v16 = vmul.f32 %v129_v13, %v122_v14 }
  0x89   :  { %v62_v52 = vmul.f32 %v55_v47, %v55_v47  ;;  %v63_v53 = vmul.f32 %v59_v48, %v59_v48 }
  0x8a   :  { %v125_v17 = vsel %vm75_vm2, %v124_v15, 0.0  ;;  %v131_v18 = vsel %vm75_vm2, %v130_v16, 0.0 }
  0x8b   :  { %126 = vadd.xlane.f32.xlu2 %v125_v17  ;;  %132 = vadd.xlane.f32.xlu0 %v131_v18  ;;  %v64_v55 = vadd.f32 %v63_v53, %v62_v52 }
  0x8d   :  { %v65_v57 = vmul.f32 %v64_v55, %v61_v54 }
  0x8f   :  { %v67_v59 = vsel %vm66_vm4, %v65_v57, 0.0 }
  0x92   :  { %86 = vrot.lane.b32.xlu1 %v70_v3, %s243_s1 }
  0xbc   :  { %68 = vadd.xlane.f32.xlu1 %v67_v59 }
  0xec   :  { %v78_v35 = vpop.xlane.xlu1 %77 }
  0xed   :  { %v79_v37 = vrot.slane %v78_v35, 4 }
  0xef   :  { %v80_v41 = vadd.f32 %v79_v37, %v78_v35 }
  0xf1   :  { %v81_v46 = vrot.slane %v80_v41, 2 }
  0xf3   :  { %v82_v56 = vadd.f32 %v81_v46, %v80_v41 }
  0xf5   :  { %v83_v58 = vrot.slane %v82_v56, 1 }
  0xf7   :  { %v84_v60 = vadd.f32 %v83_v58, %v82_v56 }
  0xf9   :  { %197 = vpush %v84_v60 }
  0xfe   :  { %v127_v29 = vpop.xlane.xlu2 %126  ;;  %v133_v30 = vpop.xlane.xlu0 %132 }
  0xff   :  { %v128_v31 = vadd.f32 %v127_v29, %v276_v2  ;;  %v134_v32 = vadd.f32 %v133_v30, %v276_v2 }
 0x101   :  { %v135_v36 = vmul.f32 100.0, %v134_v32  ;;  %137 = vrot.lane.b32.xlu2 %v128_v31, %s243_s1 }
 0x103   :  { %142 = vrot.lane.b32.xlu0 %v135_v36, %s243_s1 }
 0x104   :  { %v87_v61 = vpop.permute.xlu1 %86 }
 0x105   :  { %v90_v62 = vsel %vm89_vm5, %v87_v61, 0.0 }
 0x12a   :  { %s198_s5 = spop %197 }
 0x12b   :  { %v157_v15 = vstv %s198_s5 }
 0x12d   :  { %91 = vadd.xlane.f32.xlu0 %v90_v62 }
 0x12f   :  { %v69_v9 = vpop.xlane.xlu1 %68 }
 0x15b   :  { %v138_v4 = vpop.permute.xlu2 %137 }
 0x15c   :  { %v140_v5 = vsub.f32 %v276_v2, %v138_v4 }
 0x15e   :  { %v146_v7 = vmul.f32 %v140_v5, %v140_v5 }
 0x160   :  { %v147_v10 = vmul.f32 0.001, %v146_v7 }
 0x175   :  { %v143_v63 = vpop.permute.xlu0 %142 }
 0x176   :  { %v145_v0 = vsub.f32 %v276_v2, %v143_v63 }
 0x178   :  { %v148_v1 = vmul.f32 %v145_v0, %v145_v0 }
 0x17a   :  { %v149_v3 = vmul.f32 0.001, %v148_v1 }
 0x17c   :  { %151 = vrot.lane.b32.xlu2 %v149_v3, %s244_s0 }
 0x1a0   :  { %v92_v6 = vpop.xlane.xlu0 %91 }
 0x1a1   :  { %v93_v8 = vmul.f32 0.25, %v92_v6 }
 0x1a3   :  { %v155_v12 = vadd.f32 %v93_v8, %v69_v9 }
 0x1d6   :  { %v152_v11 = vpop.permute.xlu2 %151 }
 0x1d7   :  { %v154_v13 = vadd.f32 %v152_v11, %v147_v10 }
 0x1d9   :  { %v156_v14 = vadd.f32 %v155_v12, %v154_v13 }
 0x1db   :  { %v158_v16 = vadd.f32 %v157_v15, %v156_v14 }
 0x1dd   :  { %v160_v17 = vsel %vm159_vm6, %v158_v16, 0.0 }
 0x1de   :  { %v161_v18 = vrot.slane %v160_v17, 4 }
 0x1e0   :  { %v162_v19 = vadd.f32 %v161_v18, %v160_v17 }
 0x1e2   :  { %v163_v20 = vrot.slane %v162_v19, 2 }
 0x1e4   :  { %v164_v21 = vadd.f32 %v163_v20, %v162_v19 }
 0x1e6   :  { %v165_v22 = vrot.slane %v164_v21, 1 }
 0x1e8   :  { %v166_v2 = vadd.f32 %v165_v22, %v164_v21 }
 0x1ea   :  { %168 = vrot.lane.b32.xlu2 %v166_v2, %s245_s6 }
 0x244   :  { %v169_v23 = vpop.permute.xlu2 %168 }
 0x245   :  { %172 = vst.msk [vmem:[#allocation2] sm:$0x1] %vm171_vm7, %v169_v23 }
 0x246   :  { %183 = dma.vmem_to_hbm [thread:$0]  %s179_s8, 16, %s181_s11, [#allocation3]  }
 0x247   :  { %237 = dma.done.wait [#allocation3], 16  }
 0x248   :  { %238 = vsyncadd [#allocation3], 4294967280 }
 0x249   :  { %188 = vsyncpa [#allocation3], 1 }

</bundles_post_ra>
